<compile_context>
chip_gen: v7x
topology: tpu7x:2x2x1
jax: 0.10.0
libtpu: 0.0.40
codegen_flags: <defaults>
</compile_context>

<pallas_src>
import functools

import jax
import jax.numpy as jnp
from jax.experimental import pallas as pl
from jax.experimental.pallas import tpu as pltpu


# ----------------------------------------------------------------------------
# planning helpers
# ----------------------------------------------------------------------------
def _round_up(x, m):
    return (x + m - 1) // m * m


def _chip_budget():
    """(per-input-buffer VMEM budget, vmem_limit_bytes) tuned per TPU generation."""
    kind = ""
    try:
        kind = jax.devices()[0].device_kind.lower()
    except Exception:
        pass
    if "v2" in kind or "v3" in kind:          # tiny-VMEM legacy chips
        return 4 << 20, 14 << 20
    if "v4" in kind or "v5" in kind or "v6" in kind:   # 128 MiB physical VMEM
        return 20 << 20, 64 << 20
    # v7x (64 MiB physical / 32 MiB scoped) or unknown: stay conservative.
    return 12 << 20, 32 << 20


def _pick_pack(n_rows, feature_dim):
    """Lane-packing factor k: pack k gene-set rows into one 128-lane row."""
    if 8 <= feature_dim < 128 and 128 % feature_dim == 0:
        k = 128 // feature_dim
        while k > 1 and n_rows % k:
            k //= 2
        return k
    return 1


def _plan(R, C, itemsize, budget):
    """Pick (row_tile, n_row_tiles, col_tile, n_col_tiles, mask_tail).

    VMEM footprint of a (tr, tc) block is tr * round_up(tc, 128) * itemsize
    (lane padding counted; sublane packing of sub-32-bit dtypes is exact once
    tr is a multiple of 128, which it always is when we tile).
    """
    lane_c = _round_up(C, 128)
    # Split the feature axis only when even a minimal 128-row block would blow
    # the per-buffer budget (i.e. extremely large feature_dim).
    if lane_c * itemsize * 128 > budget and C > 128:
        tc = max(128, min((budget // (128 * itemsize)) // 128 * 128, lane_c))
        n_ct = pl.cdiv(C, tc)
    else:
        tc, n_ct = C, 1
    block_c = _round_up(tc, 128)

    cap = (budget // max(1, block_c * itemsize)) // 128 * 128
    cap = max(128, min(cap, 8192))            # large tiles amortize ~0.35us/step
    if R > cap:
        tr = cap
    elif R >= 512:
        tr = _round_up(pl.cdiv(R, 2), 128)    # >=2 row tiles -> both v7x TCs busy
    else:
        tr = R                                # block == full rows (always legal)
    n_rt = pl.cdiv(R, tr)
    mask_tail = (n_ct > 1) and (C % tc != 0)
    return tr, n_rt, tc, n_ct, mask_tail


# ----------------------------------------------------------------------------
# linear / mean:  scores = x_packed @ W_packed (+ bias)  on the MXU
#   x_packed : (R, C) with C = k*F,   W_packed : (C, k) block-diagonal
# ----------------------------------------------------------------------------
def _dot_kernel(x_ref, w_ref, b_ref, o_ref, acc_ref, *, tc, total_c, mask_tail):
    # x_ref: (tr, tc) native dtype | w_ref: (tc, k) x.dtype | b_ref: (1,) f32 SMEM
    # o_ref: (k, tr) out dtype      | acc_ref: (tr, k) f32 scratch
    j = pl.program_id(1)

    @pl.when(j == 0)
    def _init():
        acc_ref[...] = jnp.zeros_like(acc_ref)

    x = x_ref[...]
    if mask_tail:
        # Last feature block may read past the array: zero the garbage columns
        # (the packed weight is also zero there, belt & suspenders vs NaN/Inf).
        col = jax.lax.broadcasted_iota(jnp.int32, x.shape, 1) + j * tc
        x = jnp.where(col < total_c, x, jnp.zeros_like(x))

    acc_ref[...] += jnp.dot(x, w_ref[...], preferred_element_type=jnp.float32)

    @pl.when(j == pl.num_programs(1) - 1)
    def _finalize():
        # Tiny (tr, k) -> (k, tr) relayout so the output stores are lane-dense.
        o_ref[...] = (acc_ref[...] + b_ref[0]).T.astype(o_ref.dtype)


def _gene_set_dot(x, w_col, bias_scalar):
    """Row-wise dot of every (gene-set) row of x with w_col, plus bias."""
    B, G, F = x.shape
    N = B * G
    k = _pick_pack(N, F)
    R, C = N // k, k * F
    x2d = x.reshape(R, C)                      # free, contiguous view (no copy)

    budget, vmem_limit = _chip_budget()
    itemsize = jnp.dtype(x.dtype).itemsize
    tr, n_rt, tc, n_ct, mask_tail = _plan(R, C, itemsize, budget)

    # Block-diagonal packed weight: column j holds w_col at rows [j*F, (j+1)*F).
    w_packed = jnp.kron(jnp.eye(k, dtype=jnp.float32),
                        w_col.reshape(F, 1).astype(jnp.float32))
    if n_ct * tc != C:
        # Zero rows for the feature-split tail -> OOB columns contribute 0.
        w_packed = jnp.pad(w_packed, ((0, n_ct * tc - C), (0, 0)))
    w_packed = w_packed.astype(x.dtype)        # native dtype into the MXU
    b = jnp.reshape(bias_scalar, (1,)).astype(jnp.float32)

    kern = functools.partial(_dot_kernel, tc=tc, total_c=C, mask_tail=mask_tail)
    out = pl.pallas_call(
        kern,
        out_shape=jax.ShapeDtypeStruct((k, R), x.dtype),
        grid=(n_rt, n_ct),
        in_specs=[
            pl.BlockSpec((tr, tc), lambda i, j: (i, j)),          # streamed rows
            pl.BlockSpec((tc, k), lambda i, j: (j, 0)),           # packed weight
            pl.BlockSpec(memory_space=pltpu.MemorySpace.SMEM),    # scalar bias
        ],
        out_specs=pl.BlockSpec((k, tr), lambda i, j: (0, i)),     # lane-dense rows
        scratch_shapes=[pltpu.VMEM((tr, k), jnp.float32)],
        compiler_params=pltpu.CompilerParams(
            dimension_semantics=("parallel", "arbitrary"),
            vmem_limit_bytes=vmem_limit,
        ),
    )(x2d, w_packed, b)
    # out[j, r] is the score of original flat row r*k + j -> transpose (tiny).
    return out.T.reshape(B, G)


def gene_set_score_linear(x, weight, bias):
    """x: (B, G, F); weight: (F,) or (F, 1); bias: scalar -> (B, G)."""
    return _gene_set_dot(x, jnp.reshape(weight, (-1,)), bias)


def gene_set_score_mean(x):
    F = x.shape[-1]
    return _gene_set_dot(x, jnp.full((F,), 1.0 / F, jnp.float32), jnp.float32(0.0))


# ----------------------------------------------------------------------------
# max pooling: transpose once (native dtype) + per-segment sublane max
# ----------------------------------------------------------------------------
def _max_kernel(x_ref, o_ref, *, k, f):
    # x_ref: (tr, k*f) native dtype | o_ref: (k, tr) native dtype
    xt = x_ref[...].T                          # single XLU transpose, no upcast
    for j in range(k):                         # k <= 16, fully unrolled
        o_ref[j, :] = jnp.max(xt[j * f:(j + 1) * f, :], axis=0).astype(o_ref.dtype)


def gene_set_score_max(x):
    B, G, F = x.shape
    N = B * G
    k = _pick_pack(N, F)
    R, C = N // k, k * F
    x2d = x.reshape(R, C)                      # free, contiguous view

    budget, vmem_limit = _chip_budget()
    tr, n_rt, tc, n_ct, _ = _plan(R, C, jnp.dtype(x.dtype).itemsize, budget)
    if n_ct != 1:
        # TODO(synk): add a feature-split running-max accumulator path for
        # extremely large feature_dim (>~24K f32); not needed for gene-set sizes.
        raise NotImplementedError("max pooling with this feature_dim is not supported")

    kern = functools.partial(_max_kernel, k=k, f=F)
    out = pl.pallas_call(
        kern,
        out_shape=jax.ShapeDtypeStruct((k, R), x.dtype),
        grid=(n_rt,),
        in_specs=[pl.BlockSpec((tr, C), lambda i: (i, 0))],
        out_specs=pl.BlockSpec((k, tr), lambda i: (0, i)),
        compiler_params=pltpu.CompilerParams(
            dimension_semantics=("parallel",),
            vmem_limit_bytes=vmem_limit,
        ),
    )(x2d)
    return out.T.reshape(B, G)


# ----------------------------------------------------------------------------
# GeneSetScorer wrapper
# ----------------------------------------------------------------------------
class GeneSetScorer:
    def __init__(self, feature_dim, mode="linear", pooling_type="mean", key=None):
        self.mode = mode
        self.feature_dim = feature_dim
        self.pooling_type = pooling_type
        if mode == "linear":
            # Deterministic init mimicking nn.Linear: U(-1/sqrt(F), 1/sqrt(F))
            if key is None:
                key = jax.random.PRNGKey(42)
            kw, kb = jax.random.split(key)
            bound = 1.0 / (feature_dim ** 0.5)
            self.weight = jax.random.uniform(kw, (feature_dim,), jnp.float32, -bound, bound)
            self.bias = jax.random.uniform(kb, (), jnp.float32, -bound, bound)
        elif mode == "pooling":
            if pooling_type not in ("mean", "max"):
                raise ValueError("Invalid pooling type. Use 'mean' or 'max'.")
            self.weight = None
            self.bias = None
        else:
            raise ValueError("Invalid mode type. Use 'mean','max' or 'linear'. ")

    def __call__(self, x):
        if self.mode == "linear":
            return gene_set_score_linear(x, self.weight, self.bias)
        if self.pooling_type == "mean":
            return gene_set_score_mean(x)
        if self.pooling_type == "max":
            return gene_set_score_max(x)
        raise ValueError("Invalid pooling type. Use 'mean' or 'max'.")


if __name__ == "__main__":
    key = jax.random.PRNGKey(0)
    kx, kp, kx2, kx3 = jax.random.split(key, 4)

    # Small shapes consistent with the module: (batch=2, num_gene_sets=4, feature_dim=32)
    B, G, F = 2, 4, 32
    x = jax.random.normal(kx, (B, G, F), dtype=jnp.float32)

    # --- linear mode (MXU path, packed k=4) ---
    scorer_lin = GeneSetScorer(F, mode="linear", key=kp)
    out_lin = jax.block_until_ready(scorer_lin(x))
    ref_lin = jnp.sum(x * scorer_lin.weight.reshape(1, 1, F), axis=-1) + scorer_lin.bias
    assert out_lin.shape == (B, G)
    # MXU default-precision rounding (bf16 passes for f32 operands) -> loose tol.
    assert jnp.allclose(out_lin, ref_lin, atol=5e-3, rtol=5e-3)

    # --- pooling mode (mean, MXU path with 1/F weights) ---
    scorer_mean = GeneSetScorer(F, mode="pooling", pooling_type="mean")
    out_mean = jax.block_until_ready(scorer_mean(x))
    assert out_mean.shape == (B, G)
    assert jnp.allclose(out_mean, jnp.mean(x, axis=2), atol=5e-3, rtol=5e-3)

    # --- pooling mode (max, native-dtype transpose + sublane reduce) ---
    scorer_max = GeneSetScorer(F, mode="pooling", pooling_type="max")
    out_max = jax.block_until_ready(scorer_max(x))
    assert out_max.shape == (B, G)
    assert jnp.allclose(out_max, jnp.max(x, axis=2), atol=1e-6)

    # --- multi-tile + partial last row block (no padding copy) ---
    B2, G2 = 16, 260                            # N=4160, k=4 -> R=1040, 2 row tiles
    x2 = jax.random.normal(kx2, (B2, G2, F), dtype=jnp.float32)
    out2 = jax.block_until_ready(scorer_lin(x2))
    ref2 = jnp.sum(x2 * scorer_lin.weight.reshape(1, 1, F), axis=-1) + scorer_lin.bias
    assert out2.shape == (B2, G2)
    assert jnp.allclose(out2, ref2, atol=5e-3, rtol=5e-3)

    # --- unpacked path (F does not divide 128) ---
    F3 = 48
    x3 = jax.random.normal(kx3, (2, 4, F3), dtype=jnp.float32)
    scorer_max3 = GeneSetScorer(F3, mode="pooling", pooling_type="max")
    out3 = jax.block_until_ready(scorer_max3(x3))
    assert jnp.allclose(out3, jnp.max(x3, axis=2), atol=1e-6)

    print("KERNEL_OK")
</pallas_src>

<mosaic_0001>
module attributes {stable_mosaic.version = 11 : i64} {
  func.func @_dot_kernel(%arg0: i32, %arg1: i32, %arg2: memref<2x128xf32, #tpu.memory_space<vmem>>, %arg3: memref<128x4xf32, #tpu.memory_space<vmem>>, %arg4: memref<1xf32, #tpu.memory_space<smem>>, %arg5: memref<4x2xf32, #tpu.memory_space<vmem>>, %arg6: memref<2x4xf32, #tpu.memory_space<vmem>>) attributes {dimension_semantics = [#tpu.dimension_semantics<parallel>, #tpu.dimension_semantics<arbitrary>], iteration_bounds = array<i64: 1, 1>, scalar_prefetch = 0 : i64, scratch_operands = 1 : i64, tpu.core_type = #tpu.core_type<tc>, window_params = [{transform_indices = @transform_0, window_bounds = array<i64: 2, 128>}, {transform_indices = @transform_1, window_bounds = array<i64: 128, 4>}, {transform_indices = @transform_2, window_bounds = array<i64: 1>}, {transform_indices = @transform_3, window_bounds = array<i64: 4, 2>}]} {
    %c0_i32 = arith.constant 0 : i32
    %0 = arith.cmpi eq, %arg1, %c0_i32 : i32
    %1 = arith.extui %0 : i1 to i32
    %c0_i32_0 = arith.constant 0 : i32
    %2 = arith.cmpi ne, %1, %c0_i32_0 : i32
    scf.if %2 {
      %cst_10 = arith.constant 0.000000e+00 : f32
      %12 = vector.broadcast %cst_10 : f32 to vector<2x4xf32>
      %c0_11 = arith.constant 0 : index
      %c0_12 = arith.constant 0 : index
      %13 = vector.load %arg6[%c0_11, %c0_12] : memref<2x4xf32, #tpu.memory_space<vmem>>, vector<2x4xf32>
      tpu.vector_store %arg6[%c0_11, %c0_12], %12 {strides = array<i32>} : memref<2x4xf32, #tpu.memory_space<vmem>>, vector<2x4xf32>,
    } else {
    }
    %c0 = arith.constant 0 : index
    %c0_1 = arith.constant 0 : index
    %3 = vector.load %arg2[%c0, %c0_1] : memref<2x128xf32, #tpu.memory_space<vmem>>, vector<2x128xf32>
    %c0_2 = arith.constant 0 : index
    %c0_3 = arith.constant 0 : index
    %4 = vector.load %arg6[%c0_2, %c0_3] : memref<2x4xf32, #tpu.memory_space<vmem>>, vector<2x4xf32>
    %c0_4 = arith.constant 0 : index
    %c0_5 = arith.constant 0 : index
    %5 = vector.load %arg3[%c0_4, %c0_5] : memref<128x4xf32, #tpu.memory_space<vmem>>, vector<128x4xf32>
    %cst = arith.constant dense<0.000000e+00> : vector<2x4xf32>
    %6 = tpu.matmul %3, %5, %cst {dimension_numbers = #tpu.dot_dimension_numbers<[1], [0], [0], [1], [0, 0, 1, 1], [], []>} : vector<2x128xf32>, vector<128x4xf32>, vector<2x4xf32> -> vector<2x4xf32>
    %7 = arith.addf %4, %6 : vector<2x4xf32>
    %c0_6 = arith.constant 0 : index
    %c0_7 = arith.constant 0 : index
    %8 = vector.load %arg6[%c0_6, %c0_7] : memref<2x4xf32, #tpu.memory_space<vmem>>, vector<2x4xf32>
    tpu.vector_store %arg6[%c0_6, %c0_7], %7 {strides = array<i32>} : memref<2x4xf32, #tpu.memory_space<vmem>>, vector<2x4xf32>,
    %c0_i32_8 = arith.constant 0 : i32
    %9 = arith.cmpi eq, %arg1, %c0_i32_8 : i32
    %10 = arith.extui %9 : i1 to i32
    %c0_i32_9 = arith.constant 0 : i32
    %11 = arith.cmpi ne, %10, %c0_i32_9 : i32
    scf.if %11 {
      %c0_10 = arith.constant 0 : index
      %c0_11 = arith.constant 0 : index
      %12 = vector.load %arg6[%c0_10, %c0_11] : memref<2x4xf32, #tpu.memory_space<vmem>>, vector<2x4xf32>
      %c0_12 = arith.constant 0 : index
      %13 = memref.load %arg4[%c0_12] : memref<1xf32, #tpu.memory_space<smem>>
      %14 = vector.broadcast %13 : f32 to vector<2x4xf32>
      %15 = arith.addf %12, %14 : vector<2x4xf32>
      %16 = tpu.transpose %15, [1, 0] : vector<2x4xf32> -> vector<4x2xf32>
      %c0_13 = arith.constant 0 : index
      %c0_14 = arith.constant 0 : index
      %17 = vector.load %arg5[%c0_13, %c0_14] : memref<4x2xf32, #tpu.memory_space<vmem>>, vector<4x2xf32>
      tpu.vector_store %arg5[%c0_13, %c0_14], %16 {strides = array<i32>} : memref<4x2xf32, #tpu.memory_space<vmem>>, vector<4x2xf32>,
    } else {
    }
    return
  }
  func.func @transform_0(%arg0: i32, %arg1: i32) -> (i32, i32) {
    %c0_i32 = arith.constant 0 : i32
    return %arg0, %arg1 : i32, i32
  }
  func.func @transform_1(%arg0: i32, %arg1: i32) -> (i32, i32) {
    %c0_i32 = arith.constant 0 : i32
    %c0_i32_0 = arith.constant 0 : i32
    return %arg1, %c0_i32 : i32, i32
  }
  func.func @transform_2(%arg0: i32, %arg1: i32) -> i32 {
    %c0_i32 = arith.constant 0 : i32
    %c0_i32_0 = arith.constant 0 : i32
    return %c0_i32 : i32
  }
  func.func @transform_3(%arg0: i32, %arg1: i32) -> (i32, i32) {
    %c0_i32 = arith.constant 0 : i32
    %c0_i32_0 = arith.constant 0 : i32
    return %c0_i32, %arg0 : i32, i32
  }
}

</mosaic_0001>

<bundles_post_ra>
// kernel: tpu_custom_call.1
= control target key start
LH: loop header
LB: loop body
LE: loop exit
PB: predicated region body
PF: predicated region fallthrough
CT: control target
= control target key end

     0   :  { %vm19_vm0 = vcmask 25600   ;;  %v236_v0 = vmov 0.0|0.0   ;;  %v237_v4 = vmov 0.0   ;;  %vm238_vm1 = vmmov 0   ;;  %s318_s1 = inlined_call_operand.vmem [shape: f32[128,4], index: 1, kind: input, shape index: {}]   ;;  %s319_s0 = inlined_call_operand.vmem [shape: f32[2,128], index: 0, kind: input, shape index: {}]   ;;  %s320_s2 = inlined_call_operand.<no memory space> [shape: f32[1], index: 2, kind: input, shape index: {}]   ;;  %s321_s3 = inlined_call_operand.vmem [shape: f32[4,2], index: 3, kind: output, shape index: {}]  }
   0x1   :  { %209 = vmatprep.subr.bf16.mxu0 %v236_v0  ;;  %v23_v1 = vld [vmem:[%s318_s1] sm:$0xff]  ;;  %v24_v2 = vld [vmem:[%s318_s1 + $0x8] sm:$0xff]  ;;  %v25_v3 = vld [vmem:[%s318_s1 + $0x10] sm:$0xff]  ;;  %20 = vst.msk [vmem:[#allocation2] sm:$0x3] %vm19_vm0, %v237_v4  ;;  %206 = vmatprep.mubr.msk.f32.mxu0 %vm238_vm1, %v237_v4  ;;  %v117_v31 = vstv %s320_s2  ;;  %vm151_vm2 = vcmask 11264  }
   0x2   :  { %v210_v5 = vpack.c.bf16 %v24_v2, %v23_v1  ;;  %v26_v6 = vld [vmem:[%s318_s1 + $0x18] sm:$0xff]  ;;  %v27_v8 = vld [vmem:[%s318_s1 + $0x20] sm:$0xff]  ;;  %v28_v9 = vld [vmem:[%s318_s1 + $0x28] sm:$0xff] }
   0x3   :  { %v213_v7 = vpack.c.bf16 %v26_v6, %v25_v3  ;;  %v216_v10 = vpack.c.bf16 %v28_v9, %v27_v8  ;;  %v29_v11 = vld [vmem:[%s318_s1 + $0x30] sm:$0xff]  ;;  %v30_v12 = vld [vmem:[%s318_s1 + $0x38] sm:$0xff]  ;;  %v31_v14 = vld [vmem:[%s318_s1 + $0x40] sm:$0xff] }
   0x4   :  { %211 = vmatpush3.bf16.msra.mxu0 %v210_v5  ;;  %v219_v13 = vpack.c.bf16 %v30_v12, %v29_v11  ;;  %v32_v15 = vld [vmem:[%s318_s1 + $0x48] sm:$0xff]  ;;  %v33_v17 = vld [vmem:[%s318_s1 + $0x50] sm:$0xff]  ;;  %v34_v18 = vld [vmem:[%s318_s1 + $0x58] sm:$0xff] }
   0x5   :  { %212 = vmatprep.subr.bf16.mxu0 %v236_v0  ;;  %v222_v16 = vpack.c.bf16 %v32_v15, %v31_v14  ;;  %v225_v19 = vpack.c.bf16 %v34_v18, %v33_v17  ;;  %v35_v20 = vld [vmem:[%s318_s1 + $0x60] sm:$0xff]  ;;  %v36_v21 = vld [vmem:[%s318_s1 + $0x68] sm:$0xff]  ;;  %v37_v23 = vld [vmem:[%s318_s1 + $0x70] sm:$0xff] }
   0x6   :  { %v228_v22 = vpack.c.bf16 %v36_v21, %v35_v20  ;;  %v38_v24 = vld [vmem:[%s318_s1 + $0x78] sm:$0xff]  ;;  %v21_v26 = vld [vmem:[%s319_s0] sm:$0x3] }
   0x7   :  { %v231_v25 = vpack.c.bf16 %v38_v24, %v37_v23 }
   0x8   :  { %214 = vmatpush3.bf16.msra.mxu0 %v213_v7  ;;  %v22_v27 = vld [vmem:[#allocation2] sm:$0x3] }
   0x9   :  { %215 = vmatprep.subr.bf16.mxu0 %v236_v0 }
   0xc   :  { %217 = vmatpush3.bf16.msra.mxu0 %v216_v10 }
   0xd   :  { %218 = vmatprep.subr.bf16.mxu0 %v236_v0 }
  0x10   :  { %220 = vmatpush3.bf16.msra.mxu0 %v219_v13 }
  0x11   :  { %221 = vmatprep.subr.bf16.mxu0 %v236_v0 }
  0x14   :  { %223 = vmatpush3.bf16.msra.mxu0 %v222_v16 }
  0x15   :  { %224 = vmatprep.subr.bf16.mxu0 %v236_v0 }
  0x18   :  { %226 = vmatpush3.bf16.msra.mxu0 %v225_v19 }
  0x19   :  { %227 = vmatprep.subr.bf16.mxu0 %v236_v0 }
  0x1c   :  { %229 = vmatpush3.bf16.msra.mxu0 %v228_v22 }
  0x1d   :  { %230 = vmatprep.subr.bf16.mxu0 %v236_v0 }
  0x20   :  { %232 = vmatpush3.bf16.msra.mxu0 %v231_v25 }
  0x23   :  { %207 = vmatmul.mubr.f32.vlgmr.msra.gmra.mrb[0].mxu0 %v21_v26 }
  0xf6   :  { %v105_v28 = vpop.f32.mrb[0].mxu0 }
  0xf7   :  { %v109_v29 = vadd.f32 %v105_v28, %v22_v27  ;;  %v208_v30 = vpop.f32.mrb[1].mxu0 }
  0xf9   :  { %111 = vst.msk [vmem:[#allocation2] sm:$0x3] %vm19_vm0, %v109_v29 }
 0x100   :  { %v115_v32 = vld [vmem:[#allocation2] sm:$0x3] }
 0x101   :  { %v118_v33 = vadd.f32 %v117_v31, %v115_v32 }
 0x103   :  { %119 = vxpose.xlu0.b32.start.end [1/1] (short) (narrow) %v118_v33, 8 }
 0x183   :  { %v135_v34 = vpop.trf.xlu0 }
 0x184   :  { %152 = vst.msk [vmem:[%s321_s3] sm:$0xf] %vm151_vm2, %v135_v34 }

</bundles_post_ra>
